<compile_context>
chip_gen: v7x
topology: tpu7x:2x2x1
jax: 0.10.0
libtpu: 0.0.40
codegen_flags: <defaults>
</compile_context>

<pallas_src>
import jax
import jax.numpy as jnp
from jax import lax
from jax.experimental import pallas as pl
from jax.experimental.pallas import tpu as pltpu


def _head_kernel(x_ref, wqkv_ref, o_ref):
    # x_ref:    (bb*T, C)  bf16 — batch collapsed into the matmul M dimension
    # wqkv_ref: (C, 3H)    bf16 — [q*scale | k | v] fused, lane-dense (3H >= 128)
    # o_ref:    (bb, T, H) f32
    bb, T, H = o_ref.shape

    # Single fused QKV projection on the MXU, f32 accumulation.
    qkv = jnp.dot(x_ref[...], wqkv_ref[...],
                  preferred_element_type=jnp.float32)            # (bb*T, 3H)
    qkv = qkv.reshape(bb, T, 3 * H)
    q = qkv[..., 0 * H:1 * H]     # C**-0.5 scale already folded into the weights
    k = qkv[..., 1 * H:2 * H]
    v = qkv[..., 2 * H:3 * H]

    # Scores via transposed contraction (no explicit k.T / XLU transpose).
    wei = jnp.einsum('bqh,bkh->bqk',
                     q.astype(jnp.bfloat16), k.astype(jnp.bfloat16),
                     preferred_element_type=jnp.float32)         # (bb, T, T)

    # Causal mask: keep j <= i (diagonal always kept -> rows never fully
    # masked, so exp/softmax never sees an all -inf row). Built once at (T, T)
    # and broadcast across the batch inside the where.
    row = lax.broadcasted_iota(jnp.int32, (T, T), 0)
    col = lax.broadcasted_iota(jnp.int32, (T, T), 1)
    keep = (col <= row)[None, :, :]                              # (1, T, T)
    wei = jnp.where(keep, wei, -jnp.inf)

    # Numerically-stable softmax over the last dim.
    m = jnp.max(wei, axis=-1, keepdims=True)
    e = jnp.exp(wei - m)
    s = jnp.sum(e, axis=-1, keepdims=True)
    p = e * pl.reciprocal(s, approx=True)      # EUP reciprocal, off the VALU path

    # Dropout: inference mode -> identity.
    # TODO(synk): training-mode stochastic dropout (pltpu.prng_*) not implemented.

    out = jnp.einsum('bqk,bkh->bqh',
                     p.astype(jnp.bfloat16), v.astype(jnp.bfloat16),
                     preferred_element_type=jnp.float32)         # (bb, T, H)
    o_ref[...] = out.astype(o_ref.dtype)


def head_forward(x, w_key, w_query, w_value, *, batch_block=None):
    """x: (B, T, C) float32; w_*: (headsize, C) torch nn.Linear convention."""
    B, T, C = x.shape
    H = w_key.shape[0]

    bb = B if batch_block is None else batch_block
    assert B % bb == 0, "batch_block must divide B"
    nb = B // bb

    # Fuse QKV weights into one lane-dense (C, 3H) matrix; fold the C**-0.5
    # scale into the query projection (free on the wrapper side).
    scale = jnp.asarray(C, jnp.float32) ** -0.5
    w_qkv = jnp.concatenate(
        [w_query.T.astype(jnp.float32) * scale,
         w_key.T.astype(jnp.float32),
         w_value.T.astype(jnp.float32)], axis=1)                 # (C, 3H)

    # bf16 MXU operands; accumulation stays f32 inside the kernel.
    x2d = x.reshape(B * T, C).astype(jnp.bfloat16)
    w_qkv = w_qkv.astype(jnp.bfloat16)

    cost = pl.CostEstimate(
        flops=2 * B * T * C * 3 * H + 2 * 2 * B * T * T * H,
        transcendentals=B * T * T,
        bytes_accessed=B * T * C * 2 + C * 3 * H * 2 + B * T * H * 4,
    )

    grid_spec = pltpu.PrefetchScalarGridSpec(
        num_scalar_prefetch=0,
        grid=(nb,),
        in_specs=[
            pl.BlockSpec((bb * T, C), lambda i: (i, 0)),
            pl.BlockSpec((C, 3 * H), lambda i: (0, 0)),
        ],
        out_specs=pl.BlockSpec((bb, T, H), lambda i: (i, 0, 0)),
    )

    return pl.pallas_call(
        _head_kernel,
        out_shape=jax.ShapeDtypeStruct((B, T, H), x.dtype),
        grid_spec=grid_spec,
        compiler_params=pltpu.CompilerParams(
            dimension_semantics=("parallel",)),
        cost_estimate=cost,
    )(x2d, w_qkv)


def head_forward_ref(x, w_key, w_query, w_value):
    """Pure-JAX f32 reference mirroring the PyTorch forward (eval mode)."""
    B, T, C = x.shape
    k = x @ w_key.T
    q = x @ w_query.T
    v = x @ w_value.T
    wei = (q @ jnp.swapaxes(k, -2, -1)) * (C ** -0.5)
    mask = jnp.tril(jnp.ones((T, T), dtype=bool))
    wei = jnp.where(mask[None, :, :], wei, -jnp.inf)
    wei = jax.nn.softmax(wei, axis=-1)
    return wei @ v


if __name__ == "__main__":
    # Small shapes consistent with the module: (B, T, C) with C = embed_size.
    B, T, C, HEADSIZE = 2, 8, 384, 64

    key = jax.random.PRNGKey(0)
    kx, kk, kq, kv = jax.random.split(key, 4)
    x = jax.random.normal(kx, (B, T, C), dtype=jnp.float32)
    # Deterministic init of nn.Linear(embed_size, headsize, bias=False) weights:
    # torch weight shape is (headsize, embed_size).
    bound = 1.0 / (C ** 0.5)
    w_key = jax.random.uniform(kk, (HEADSIZE, C), jnp.float32, -bound, bound)
    w_query = jax.random.uniform(kq, (HEADSIZE, C), jnp.float32, -bound, bound)
    w_value = jax.random.uniform(kv, (HEADSIZE, C), jnp.float32, -bound, bound)

    out = head_forward(x, w_key, w_query, w_value)
    out = jax.block_until_ready(out)

    ref = head_forward_ref(x, w_key, w_query, w_value)
    assert out.shape == (B, T, HEADSIZE)
    # bf16 MXU operands (f32 accumulation) -> loosened tolerance vs f32 ref.
    assert jnp.allclose(out, ref, atol=5e-2, rtol=5e-2), "mismatch vs reference"

    print("KERNEL_OK")
</pallas_src>

<mosaic_0001>
module attributes {stable_mosaic.version = 11 : i64} {
  func.func @_head_kernel(%arg0: i32, %arg1: memref<16x384xbf16, #tpu.memory_space<vmem>>, %arg2: memref<384x192xbf16, #tpu.memory_space<vmem>>, %arg3: memref<2x8x64xf32, #tpu.memory_space<vmem>>) attributes {dimension_semantics = [#tpu.dimension_semantics<parallel>], iteration_bounds = array<i64: 1>, scalar_prefetch = 0 : i64, scratch_operands = 0 : i64, tpu.core_type = #tpu.core_type<tc>, window_params = [{transform_indices = @transform_0, window_bounds = array<i64: 16, 384>}, {pipeline_mode = #tpu.pipeline_mode<synchronous>, transform_indices = @transform_1, window_bounds = array<i64: 384, 192>}, {transform_indices = @transform_2, window_bounds = array<i64: 2, 8, 64>}]} {
    %c0 = arith.constant 0 : index
    %c0_0 = arith.constant 0 : index
    %0 = vector.load %arg1[%c0, %c0_0] : memref<16x384xbf16, #tpu.memory_space<vmem>>, vector<16x384xbf16>
    %c0_1 = arith.constant 0 : index
    %c0_2 = arith.constant 0 : index
    %1 = vector.load %arg2[%c0_1, %c0_2] : memref<384x192xbf16, #tpu.memory_space<vmem>>, vector<384x192xbf16>
    %cst = arith.constant dense<0.000000e+00> : vector<16x192xf32>
    %2 = tpu.matmul %0, %1, %cst {dimension_numbers = #tpu.dot_dimension_numbers<[1], [0], [0], [1], [0, 0, 1, 1], [], []>} : vector<16x384xbf16>, vector<384x192xbf16>, vector<16x192xf32> -> vector<16x192xf32>
    %3 = vector.shape_cast %2 : vector<16x192xf32> to vector<2x8x192xf32>
    %4 = vector.extract_strided_slice %3 {offsets = [0, 0, 0], sizes = [2, 8, 64], strides = [1, 1, 1]} : vector<2x8x192xf32> to vector<2x8x64xf32>
    %5 = vector.extract_strided_slice %3 {offsets = [0, 0, 64], sizes = [2, 8, 64], strides = [1, 1, 1]} : vector<2x8x192xf32> to vector<2x8x64xf32>
    %6 = vector.extract_strided_slice %3 {offsets = [0, 0, 128], sizes = [2, 8, 64], strides = [1, 1, 1]} : vector<2x8x192xf32> to vector<2x8x64xf32>
    %7 = arith.truncf %4 : vector<2x8x64xf32> to vector<2x8x64xbf16>
    %8 = arith.truncf %5 : vector<2x8x64xf32> to vector<2x8x64xbf16>
    "tpu.trace_start"() <{level = 10 : i32, message = "bqh,bkh->bqk"}> : () -> ()
    %cst_3 = arith.constant dense<0.000000e+00> : vector<2x8x8xf32>
    %9 = tpu.matmul %7, %8, %cst_3 {dimension_numbers = #tpu.dot_dimension_numbers<[2], [2], [1], [1], [0, 0, 0, 1, 1, 1], [0], [0]>} : vector<2x8x64xbf16>, vector<2x8x64xbf16>, vector<2x8x8xf32> -> vector<2x8x8xf32>
    "tpu.trace_stop"() : () -> ()
    %10 = tpu.iota {dimensions = array<i32: 0>} : vector<8x8xi32>
    %11 = tpu.iota {dimensions = array<i32: 1>} : vector<8x8xi32>
    %12 = arith.cmpi sle, %11, %10 : vector<8x8xi32>
    %13 = vector.shape_cast %12 : vector<8x8xi1> to vector<1x8x8xi1>
    %cst_4 = arith.constant 0xFF800000 : f32
    %14 = vector.shape_cast %13 : vector<1x8x8xi1> to vector<1x8x8xi1>
    %15 = vector.broadcast %14 : vector<1x8x8xi1> to vector<2x8x8xi1>
    %16 = vector.broadcast %cst_4 : f32 to vector<2x8x8xf32>
    %17 = arith.select %15, %9, %16 : vector<2x8x8xi1>, vector<2x8x8xf32>
    %cst_5 = arith.constant dense<0xFF800000> : vector<2x8xf32>
    %18 = vector.multi_reduction <maximumf>, %17, %cst_5 [2] : vector<2x8x8xf32> to vector<2x8xf32>
    %19 = vector.shape_cast %18 : vector<2x8xf32> to vector<2x8x1xf32>
    %20 = vector.broadcast %19 : vector<2x8x1xf32> to vector<2x8x8xf32>
    %21 = arith.subf %17, %20 : vector<2x8x8xf32>
    %22 = math.exp %21 : vector<2x8x8xf32>
    %cst_6 = arith.constant dense<0.000000e+00> : vector<2x8xf32>
    %23 = vector.multi_reduction <add>, %22, %cst_6 [2] : vector<2x8x8xf32> to vector<2x8xf32>
    %24 = vector.shape_cast %23 : vector<2x8xf32> to vector<2x8x1xf32>
    %25 = tpu.reciprocal %24 {approx = true} : vector<2x8x1xf32> -> vector<2x8x1xf32>
    %26 = vector.broadcast %25 : vector<2x8x1xf32> to vector<2x8x8xf32>
    %27 = arith.mulf %22, %26 : vector<2x8x8xf32>
    %28 = arith.truncf %27 : vector<2x8x8xf32> to vector<2x8x8xbf16>
    %29 = arith.truncf %6 : vector<2x8x64xf32> to vector<2x8x64xbf16>
    "tpu.trace_start"() <{level = 10 : i32, message = "bqk,bkh->bqh"}> : () -> ()
    %cst_7 = arith.constant dense<0.000000e+00> : vector<2x8x64xf32>
    %30 = tpu.matmul %28, %29, %cst_7 {dimension_numbers = #tpu.dot_dimension_numbers<[2], [1], [1], [2], [0, 0, 0, 1, 1, 2], [0], [0]>} : vector<2x8x8xbf16>, vector<2x8x64xbf16>, vector<2x8x64xf32> -> vector<2x8x64xf32>
    "tpu.trace_stop"() : () -> ()
    %c0_8 = arith.constant 0 : index
    %c0_9 = arith.constant 0 : index
    %c0_10 = arith.constant 0 : index
    %31 = vector.load %arg3[%c0_8, %c0_9, %c0_10] : memref<2x8x64xf32, #tpu.memory_space<vmem>>, vector<2x8x64xf32>
    tpu.vector_store %arg3[%c0_8, %c0_9, %c0_10], %30 {strides = array<i32>} : memref<2x8x64xf32, #tpu.memory_space<vmem>>, vector<2x8x64xf32>,
    return
  }
  func.func @transform_0(%arg0: i32) -> (i32, i32) {
    %c0_i32 = arith.constant 0 : i32
    %c0_i32_0 = arith.constant 0 : i32
    return %arg0, %c0_i32 : i32, i32
  }
  func.func @transform_1(%arg0: i32) -> (i32, i32) {
    %c0_i32 = arith.constant 0 : i32
    %c0_i32_0 = arith.constant 0 : i32
    %c0_i32_1 = arith.constant 0 : i32
    return %c0_i32, %c0_i32_0 : i32, i32
  }
  func.func @transform_2(%arg0: i32) -> (i32, i32, i32) {
    %c0_i32 = arith.constant 0 : i32
    %c0_i32_0 = arith.constant 0 : i32
    %c0_i32_1 = arith.constant 0 : i32
    return %arg0, %c0_i32, %c0_i32_0 : i32, i32, i32
  }
}

</mosaic_0001>

<bundles_post_ra>
// kernel: tpu_custom_call.1
= control target key start
LH: loop header
LB: loop body
LE: loop exit
PB: predicated region body
PF: predicated region fallthrough
CT: control target
= control target key end

     0   :  { %v861_v2 = vmov 0   ;;  %s1074_s0 = inlined_call_operand.vmem [shape: bf16[16,384], index: 0, kind: input, shape index: {}]   ;;  %s1075_s1 = inlined_call_operand.vmem [shape: bf16[384,192], index: 1, kind: input, shape index: {}]   ;;  %s1076_s2 = inlined_call_operand.hbm [shape: f32[2,8,64], index: 2, kind: output, shape index: {}]  }
   0x1   :  { %v753_v0 = vld [vmem:[%s1075_s1 + $0x4] ss:$8 sps:$4 sm:$0xff]   ;;  %v755_v1 = vld [vmem:[%s1075_s1] ss:$8 sps:$4 sm:$0xff]   ;;  %396 = vmatprep.mubr.bf16.mxu1 %v861_v2  ;;  %v756_v3 = vld [vmem:[%s1075_s1 + $0x14] ss:$8 sps:$4 sm:$0xff]  }
   0x2   :  { %321 = vmatprep.subr.bf16.mxu0 %v753_v0  ;;  %v758_v4 = vld [vmem:[%s1075_s1 + $0x10] ss:$8 sps:$4 sm:$0xff]   ;;  %v759_v5 = vld [vmem:[%s1075_s1 + $0x24] ss:$8 sps:$4 sm:$0xff]   ;;  %v761_v6 = vld [vmem:[%s1075_s1 + $0x20] ss:$8 sps:$4 sm:$0xff]  }
   0x3   :  { %322 = vmatpush1.bf16.msra.mxu0 %v755_v1  ;;  %v762_v7 = vld [vmem:[%s1075_s1 + $0x34] ss:$8 sps:$4 sm:$0xff]   ;;  %v764_v8 = vld [vmem:[%s1075_s1 + $0x30] ss:$8 sps:$4 sm:$0xff]   ;;  %v777_v9 = vld [vmem:[%s1075_s1 + $0x104] ss:$8 sps:$4 sm:$0xff]  }
   0x4   :  { %323 = vmatprep.subr.bf16.mxu0 %v756_v3  ;;  %v779_v10 = vld [vmem:[%s1075_s1 + $0x100] ss:$8 sps:$4 sm:$0xff]   ;;  %v765_v11 = vld [vmem:[%s1075_s1 + $0x44] ss:$8 sps:$4 sm:$0xff]   ;;  %364 = vmatprep.subr.bf16.mxu1 %v777_v9  ;;  %v783_v12 = vld [vmem:[%s1075_s1 + $0x114] ss:$8 sps:$4 sm:$0xff]  }
   0x5   :  { %365 = vmatpush1.bf16.msra.mxu1 %v779_v10  ;;  %v785_v13 = vld [vmem:[%s1075_s1 + $0x110] ss:$8 sps:$4 sm:$0xff]   ;;  %v767_v14 = vld [vmem:[%s1075_s1 + $0x40] ss:$8 sps:$4 sm:$0xff]   ;;  %v768_v15 = vld [vmem:[%s1075_s1 + $0x54] ss:$8 sps:$4 sm:$0xff]  }
   0x6   :  { %366 = vmatprep.subr.bf16.mxu1 %v783_v12  ;;  %v789_v16 = vld [vmem:[%s1075_s1 + $0x124] ss:$8 sps:$4 sm:$0xff]   ;;  %v791_v17 = vld [vmem:[%s1075_s1 + $0x120] ss:$8 sps:$4 sm:$0xff]   ;;  %v770_v18 = vld [vmem:[%s1075_s1 + $0x50] ss:$8 sps:$4 sm:$0xff]  }
   0x7   :  { %324 = vmatpush1.bf16.msra.mxu0 %v758_v4  ;;  %v795_v19 = vld [vmem:[%s1075_s1 + $0x134] ss:$8 sps:$4 sm:$0xff]   ;;  %v771_v20 = vld [vmem:[%s1075_s1 + $0x64] ss:$8 sps:$4 sm:$0xff]   ;;  %v797_v21 = vld [vmem:[%s1075_s1 + $0x130] ss:$8 sps:$4 sm:$0xff]  }
   0x8   :  { %325 = vmatprep.subr.bf16.mxu0 %v759_v5  ;;  %v773_v22 = vld [vmem:[%s1075_s1 + $0x60] ss:$8 sps:$4 sm:$0xff]   ;;  %v801_v23 = vld [vmem:[%s1075_s1 + $0x144] ss:$8 sps:$4 sm:$0xff]   ;;  %v774_v24 = vld [vmem:[%s1075_s1 + $0x74] ss:$8 sps:$4 sm:$0xff]  }
   0x9   :  { %367 = vmatpush1.bf16.msra.mxu1 %v785_v13  ;;  %v803_v25 = vld [vmem:[%s1075_s1 + $0x140] ss:$8 sps:$4 sm:$0xff]   ;;  %v776_v26 = vld [vmem:[%s1075_s1 + $0x70] ss:$8 sps:$4 sm:$0xff]   ;;  %v807_v27 = vld [vmem:[%s1075_s1 + $0x154] ss:$8 sps:$4 sm:$0xff]  }
   0xa   :  { %368 = vmatprep.subr.bf16.mxu1 %v789_v16  ;;  %v780_v28 = vld [vmem:[%s1075_s1 + $0x84] ss:$8 sps:$4 sm:$0xff]   ;;  %v809_v29 = vld [vmem:[%s1075_s1 + $0x150] ss:$8 sps:$4 sm:$0xff]   ;;  %v782_v30 = vld [vmem:[%s1075_s1 + $0x80] ss:$8 sps:$4 sm:$0xff]  }
   0xb   :  { %326 = vmatpush1.bf16.msra.mxu0 %v761_v6  ;;  %v813_v31 = vld [vmem:[%s1075_s1 + $0x164] ss:$8 sps:$4 sm:$0xff]   ;;  %v786_v32 = vld [vmem:[%s1075_s1 + $0x94] ss:$8 sps:$4 sm:$0xff]   ;;  %v815_v33 = vld [vmem:[%s1075_s1 + $0x160] ss:$8 sps:$4 sm:$0xff]  }
   0xc   :  { %327 = vmatprep.subr.bf16.mxu0 %v762_v7  ;;  %v828_v34 = vld [vmem:[%s1074_s0 + $0x4] ss:$12 sps:$4 sm:$0xff]  }
   0xd   :  { %369 = vmatpush1.bf16.msra.mxu1 %v791_v17 }
   0xe   :  { %370 = vmatprep.subr.bf16.mxu1 %v795_v19 }
   0xf   :  { %328 = vmatpush1.bf16.msra.mxu0 %v764_v8 }
  0x10   :  { %329 = vmatprep.subr.bf16.mxu0 %v765_v11 }
  0x11   :  { %371 = vmatpush1.bf16.msra.mxu1 %v797_v21 }
  0x12   :  { %372 = vmatprep.subr.bf16.mxu1 %v801_v23 }
  0x13   :  { %330 = vmatpush1.bf16.msra.mxu0 %v767_v14 }
  0x14   :  { %331 = vmatprep.subr.bf16.mxu0 %v768_v15 }
  0x15   :  { %373 = vmatpush1.bf16.msra.mxu1 %v803_v25 }
  0x16   :  { %374 = vmatprep.subr.bf16.mxu1 %v807_v27 }
  0x17   :  { %332 = vmatpush1.bf16.msra.mxu0 %v770_v18 }
  0x18   :  { %333 = vmatprep.subr.bf16.mxu0 %v771_v20 }
  0x19   :  { %375 = vmatpush1.bf16.msra.mxu1 %v809_v29 }
  0x1b   :  { %334 = vmatpush1.bf16.msra.mxu0 %v773_v22 }
  0x1c   :  { %335 = vmatprep.subr.bf16.mxu0 %v774_v24 }
  0x1f   :  { %336 = vmatpush1.bf16.msra.mxu0 %v776_v26 }
  0x20   :  { %337 = vmatprep.subr.bf16.mxu0 %v780_v28 }
  0x21   :  { %7 = vsyncpa [#allocation3], 0  ;;  %v788_v35 = vld [vmem:[%s1075_s1 + $0x90] ss:$8 sps:$4 sm:$0xff]   ;;  %376 = vmatprep.subr.bf16.mxu1 %v813_v31  ;;  %v819_v36 = vld [vmem:[%s1075_s1 + $0x174] ss:$8 sps:$4 sm:$0xff]   ;;  %353 = vmatprep.mubr.bf16.mxu0 %v828_v34  ;;  %v508_v11 = vlaneseq }
  0x22   :  { %v792_v37 = vld [vmem:[%s1075_s1 + $0xa4] ss:$8 sps:$4 sm:$0xff]   ;;  %377 = vmatpush1.bf16.msra.mxu1 %v815_v33  ;;  %v821_v38 = vld [vmem:[%s1075_s1 + $0x170] ss:$8 sps:$4 sm:$0xff]   ;;  %v794_v39 = vld [vmem:[%s1075_s1 + $0xa0] ss:$8 sps:$4 sm:$0xff]  }
  0x23   :  { %338 = vmatpush1.bf16.msra.mxu0 %v782_v30  ;;  %378 = vmatprep.subr.bf16.mxu1 %v819_v36  ;;  %v798_v40 = vld [vmem:[%s1075_s1 + $0xb4] ss:$8 sps:$4 sm:$0xff]   ;;  %v800_v42 = vld [vmem:[%s1075_s1 + $0xb0] ss:$8 sps:$4 sm:$0xff]   ;;  %v804_v43 = vld [vmem:[%s1075_s1 + $0xc4] ss:$8 sps:$4 sm:$0xff]  }
  0x24   :  { %339 = vmatprep.subr.bf16.mxu0 %v786_v32  ;;  %v825_v41 = vld [vmem:[%s1074_s0 + $0x8] ss:$12 sps:$4 sm:$0xff]   ;;  %v812_v46 = vld [vmem:[%s1075_s1 + $0xd0] ss:$8 sps:$4 sm:$0xff]   ;;  %v816_v47 = vld [vmem:[%s1075_s1 + $0xe4] ss:$8 sps:$4 sm:$0xff]  }
  0x25   :  { %v806_v44 = vld [vmem:[%s1075_s1 + $0xc0] ss:$8 sps:$4 sm:$0xff]   ;;  %v810_v45 = vld [vmem:[%s1075_s1 + $0xd4] ss:$8 sps:$4 sm:$0xff]   ;;  %v824_v50 = vld [vmem:[%s1075_s1 + $0xf0] ss:$8 sps:$4 sm:$0xff]  }
  0x26   :  { %379 = vmatpush1.bf16.msra.mxu1 %v821_v38  ;;  %v818_v48 = vld [vmem:[%s1075_s1 + $0xe0] ss:$8 sps:$4 sm:$0xff]   ;;  %v822_v49 = vld [vmem:[%s1075_s1 + $0xf4] ss:$8 sps:$4 sm:$0xff]   ;;  %v862_v56 = vmov 0.0   ;;  %vm863_vm0 = vmmov 0  }
  0x27   :  { %340 = vmatpush1.bf16.msra.mxu0 %v788_v35  ;;  %v826_v51 = vld [vmem:[%s1074_s0] ss:$12 sps:$4 sm:$0xff]   ;;  %718 = vmatprep.subr.bf16.mxu1 %v862_v56  ;;  %s864_s0 = smov 64   ;;  %vm547_vm1 = vcmask 1043456   ;;  %vm412_vm2 = vcmask 523264   ;;  %v509_v12 = vshrl.u32 %v508_v11, 7 }
  0x28   :  { %341 = vmatprep.subr.bf16.mxu0 %v792_v37  ;;  %v511_v13 = vand.u32 127, %v508_v11  ;;  %vm517_vm4 = vcmask 64512   ;;  %s865_s1 = smov [#allocation2]  }
  0x29   :  { %397 = vmatmul.mubr.bf16.vlgmr.msra.gmra.mrb[0].mxu1 %v825_v41  ;;  %s644_s27 = sshll.u32 %s865_s1, 4  ;;  %s645_s27 = int_to_ptr.vmem [resolvable:$true] %s644_s27 }
  0x2a   :  { %720 = vmatprep.mubr.msk.bf16.mxu1 %vm863_vm0, %v862_v56  ;;  %vm512_vm3 = vcmp.le.s32.totalorder %v511_v13, %v509_v12  ;;  %s837_s28 = scalar_lea.vmem %s645_s27, 256  ;;  %p842_p1 = scmp.lt.s32.totalorder %s645_s27, %s645_s27 }
  0x2b   :  { %342 = vmatpush1.bf16.msra.mxu0 %v794_v39  ;;  %p838_p0 = scmp.ne.s32.totalorder %s645_s27, %s837_s28  ;;  %p843_p2 = scmp.lt.s32.totalorder %s837_s28, %s837_s28 }
  0x2c   :  { %343 = vmatprep.subr.bf16.mxu0 %v798_v40 }
  0x2d   :  { %p844_p3 = por %p843_p2, %p842_p1 }
  0x2f   :  { %344 = vmatpush1.bf16.msra.mxu0 %v800_v42  ;;  %p845_p4 = pnand %p844_p3, %p838_p0 }
  0x30   :  { %345 = vmatprep.subr.bf16.mxu0 %v804_v43 }
  0x33   :  { %346 = vmatpush1.bf16.msra.mxu0 %v806_v44 }
  0x34   :  { %347 = vmatprep.subr.bf16.mxu0 %v810_v45 }
  0x37   :  { %348 = vmatpush1.bf16.msra.mxu0 %v812_v46 }
  0x38   :  { %349 = vmatprep.subr.bf16.mxu0 %v816_v47 }
  0x3b   :  { %350 = vmatpush1.bf16.msra.mxu0 %v818_v48 }
  0x3c   :  { %351 = vmatprep.subr.bf16.mxu0 %v822_v49 }
  0x3f   :  { %352 = vmatpush1.bf16.msra.mxu0 %v824_v50 }
  0x42   :  { %354 = vmatmul.mubr.bf16.vlgmr.msra.gmra.mrb[0].mxu0 %v826_v51 }
  0xfc   :  { %v398_v52 = vpop.f32.mrb[0].mxu1 }
  0xfd   :  { %v400_v53 = vpop.f32.mrb[1].mxu1 }
  0xfe   :  { %v402_v54 = vpop.f32.mrb[2].mxu1 }
  0xff   :  { %v404_v55 = vpop.f32.mrb[3].mxu1 }
 0x115   :  { %v355_v57 = vpop.f32.mrb[0].mxu0 }
 0x116   :  { %v399_v58 = vadd.f32 %v398_v52, %v355_v57  ;;  %v357_v59 = vpop.f32.mrb[1].mxu0 }
 0x117   :  { %v401_v60 = vadd.f32 %v400_v53, %v357_v59  ;;  %v359_v61 = vpop.f32.mrb[2].mxu0 }
 0x118   :  { %v407_v62 = vpack.c.bf16 %v399_v58, %v399_v58  ;;  %v403_v63 = vadd.f32 %v402_v54, %v359_v61  ;;  %v361_v0 = vpop.f32.mrb[3].mxu0 }
 0x119   :  { %v405_v1 = vadd.f32 %v404_v55, %v361_v0  ;;  %v542_v9 = vpack.c.bf16 %v401_v60, %v401_v60 }
 0x11a   :  { %410 = vrot.lane.b32.xlu0 %v407_v62, %s864_s0  ;;  %v408_v3 = vpack.c.bf16 %v403_v63, %v403_v63 }
 0x11b   :  { %v543_v2 = vpack.c.bf16 %v405_v1, %v405_v1  ;;  %v549_v10 = vsel %vm547_vm1, %v542_v9, 0 }
 0x11d   :  { %v595_v4 = vsel %vm547_vm1, %v543_v2, 0 }
 0x11e   :  { %460 = vrot.lane.b32.xlu0 %v408_v3, %s864_s0 }
 0x18c   :  { %v411_v5 = vpop.permute.xlu0 %410 }
 0x18d   :  { %v417_v6 = vsel %vm412_vm2, %v411_v5, 0 }
 0x18e   :  { %719 = vmatpush3.bf16.xpose.msra.mxu1 %v417_v6 }
 0x18f   :  { %724 = vmatprep.subr.bf16.mxu1 %v862_v56 }
 0x190   :  { %v461_v7 = vpop.permute.xlu0 %460 }
 0x191   :  { %v466_v8 = vsel %vm412_vm2, %v461_v7, 0 }
 0x195   :  { %721 = vmatmul.mubr.msk.bf16.vlgmr.msra.gmra.mrb[4].mxu1 %vm412_vm2, %v407_v62 }
 0x196   :  { %725 = vmatpush3.bf16.xpose.msra.mxu1 %v466_v8  ;;  %726 = vmatprep.mubr.msk.bf16.mxu1 %vm863_vm0, %v862_v56 }
 0x197   :  { %730 = vmatprep.subr.bf16.mxu1 %v862_v56 }
 0x19d   :  { %727 = vmatmul.mubr.msk.bf16.vlgmr.msra.gmra.mrb[8].mxu1 %vm412_vm2, %v408_v3 }
 0x19e   :  { %731 = vmatpush3.bf16.msra.mxu1 %v549_v10  ;;  %732 = vmatprep.mubr.msk.bf16.mxu1 %vm863_vm0, %v862_v56 }
 0x19f   :  { %736 = vmatprep.subr.bf16.mxu1 %v862_v56 }
 0x268   :  { %v453_v14 = vpop.f32.mrb[4].mxu1 }
 0x269   :  { %v515_v15 = vsel %vm512_vm3, %v453_v14, -inf  ;;  %v722_v16 = vpop.f32.mrb[5].mxu1 }
 0x26a   :  { %v456_v17 = vpop.f32.mrb[6].mxu1  ;;  %v518_v18 = vsel %vm517_vm4, %v515_v15, -inf }
 0x26b   :  { %519 = vmax.xlane.f32.xlu1 %v518_v18  ;;  %v723_v19 = vpop.f32.mrb[7].mxu1 }
 0x270   :  { %v502_v20 = vpop.f32.mrb[8].mxu1 }
 0x271   :  { %v516_v21 = vsel %vm512_vm3, %v502_v20, -inf  ;;  %v728_v22 = vpop.f32.mrb[9].mxu1 }
 0x272   :  { %v505_v23 = vpop.f32.mrb[10].mxu1  ;;  %v521_v24 = vsel %vm517_vm4, %v516_v21, -inf }
 0x273   :  { %522 = vmax.xlane.f32.xlu1 %v521_v24  ;;  %v729_v25 = vpop.f32.mrb[11].mxu1 }
 0x2f8   :  { %v520_v26 = vpop.xlane.xlu1 %519 }
 0x2f9   :  { %v524_v27 = vsub.f32 %v515_v15, %v520_v26 }
 0x2fb   :  { %v526_v28 = vmul.f32 1.442695, %v524_v27 }
 0x2fd   :  { %829 = vpow2.f32 %v526_v28 }
 0x300   :  { %v523_v29 = vpop.xlane.xlu1 %522 }
 0x301   :  { %v525_v30 = vsub.f32 %v516_v21, %v523_v29 }
 0x303   :  { %v528_v31 = vmul.f32 1.442695, %v525_v30 }
 0x305   :  { %831 = vpow2.f32 %v528_v31 }
 0x307   :  { %v830_v32 = vpop.eup %829 }
 0x308   :  { %v530_v33 = vsel %vm517_vm4, %v830_v32, 0.0 }
 0x309   :  { %531 = vadd.xlane.f32.xlu0 %v530_v33 }
 0x30f   :  { %v832_v34 = vpop.eup %831 }
 0x310   :  { %v533_v35 = vsel %vm517_vm4, %v832_v34, 0.0 }
 0x311   :  { %534 = vadd.xlane.f32.xlu1 %v533_v35 }
 0x396   :  { %v532_v36 = vpop.xlane.xlu0 %531 }
 0x397   :  { %833 = vrcp.f32 %v532_v36 }
 0x39e   :  { %v535_v37 = vpop.xlane.xlu1 %534 }
 0x39f   :  { %835 = vrcp.f32 %v535_v37 }
 0x3a1   :  { %v834_v38 = vpop.eup %833 }
 0x3a2   :  { %v538_v39 = vmul.f32 %v834_v38, %v830_v32 }
 0x3a4   :  { %v540_v40 = vpack.c.bf16 %v538_v39, %v538_v39 }
 0x3a6   :  { %733 = vmatmul.mubr.msk.bf16.vlgmr.msra.gmra.mrb[12].mxu1 %vm517_vm4, %v540_v40 }
 0x3a7   :  { %737 = vmatpush3.bf16.msra.mxu1 %v595_v4  ;;  %738 = vmatprep.mubr.msk.bf16.mxu1 %vm863_vm0, %v862_v56 }
 0x3a9   :  { %v836_v41 = vpop.eup %835 }
 0x3aa   :  { %v539_v42 = vmul.f32 %v836_v41, %v832_v34 }
 0x3ac   :  { %v541_v43 = vpack.c.bf16 %v539_v42, %v539_v42 }
 0x3ae   :  { %739 = vmatmul.mubr.msk.bf16.vlgmr.msra.gmra.mrb[16].mxu1 %vm517_vm4, %v541_v43 }
 0x479   :  { %v585_v44 = vpop.f32.mrb[12].mxu1 }
 0x47a   :  { %637 = vst.msk [vmem:[#allocation2] sm:$0xff] %vm412_vm2, %v585_v44  ;;  %v734_v45 = vpop.f32.mrb[13].mxu1 }
 0x47b   :  { %v588_v46 = vpop.f32.mrb[14].mxu1 }
 0x47c   :  { %v735_v47 = vpop.f32.mrb[15].mxu1 }
 0x481   :  { %v631_v48 = vpop.f32.mrb[16].mxu1 }
 0x482   :  { %638 = vst.msk [vmem:[#allocation2 + $0x8] sm:$0xff] %vm412_vm2, %v631_v48  ;;  %v740_v49 = vpop.f32.mrb[17].mxu1 }
 0x483   :  { %v634_v50 = vpop.f32.mrb[18].mxu1 }
 0x484   :  { %848 = shalt.err (!%p845_p4)
}
 0x485   :  { %s849_s3 = scalar_lea.hbm %s1076_s2, 256 }
 0x486   :  { %p850_p5 = scmp.ne.s32.totalorder %s1076_s2, %s849_s3  ;;  %p853_p6 = scmp.lt.u32.totalorder %s849_s3, %s1076_s2 }
 0x488   :  { %p855_p7 = pnand %p853_p6, %p850_p5 }
 0x48a   :  { %858 = shalt.err (!%p855_p7)
}
 0x48b   :  { %s866_s8 = smov 128   ;;  %s867_s9 = smov 8   ;;  %v741_v51 = vpop.f32.mrb[19].mxu1 }
 0x48c   :  { %650 = dma.vmem_to_hbm [thread:$0]  %s645_s27, 256, %s1076_s2, [#allocation3], %s866_s8, %s866_s8, %s867_s9  }
 0x48d   :  { %859 = dma.done.wait [#allocation3], 256  }
 0x48e   :  { %860 = vsyncadd [#allocation3], 4294967040 }
 0x48f   :  { %654 = vsyncpa [#allocation3], 1 }

</bundles_post_ra>
